<compile_context>
chip_gen: v7x
topology: tpu7x:2x2x1
jax: 0.10.0
libtpu: 0.0.40
codegen_flags: <defaults>
</compile_context>

<pallas_src>
import jax
import jax.numpy as jnp
from jax.experimental import pallas as pl
from jax.experimental.pallas import tpu as pltpu

_LANE = 128


def _choose_tile(hw, C, itemsize, max_lanes_cap=2048,
                 dbuf_budget_bytes=16 * 1024 * 1024):
    """Largest HW tile (lanes) that keeps the double-buffered input within budget."""
    by_budget = dbuf_budget_bytes // (2 * C * itemsize)
    max_lanes = max(_LANE, (by_budget // _LANE) * _LANE)
    max_lanes = min(max_lanes, max_lanes_cap)
    if hw <= max_lanes:
        return hw           # whole spatial extent in one block (always legal)
    return max_lanes        # multiple of 128; last partial tile masked in-kernel


def _make_kernel(C, hw_total, thw):
    chunked = (thw % _LANE == 0)
    n_chunks = thw // _LANE if chunked else 0
    needs_mask = (hw_total % thw) != 0
    acc_lanes = _LANE if chunked else 1

    def kernel(x_ref, w1_ref, w2_ref, o_ref, sum_acc, max_acc):
        k = pl.program_id(1)
        nk = pl.num_programs(1)

        @pl.when(k == 0)
        def _init():
            sum_acc[...] = jnp.zeros_like(sum_acc)
            max_acc[...] = jnp.full_like(max_acc, -jnp.inf)

        x = x_ref[0].astype(jnp.float32)                      # (C, THW)

        if needs_mask:
            lane = jax.lax.broadcasted_iota(jnp.int32, (C, thw), 1)
            valid = (k * thw + lane) < hw_total
            x_sum = jnp.where(valid, x, 0.0)
            x_max = jnp.where(valid, x, -jnp.inf)
        else:
            x_sum = x
            x_max = x

        if chunked:
            # Defer the cross-lane (XLU) reduce: accumulate 128-lane partials
            # with VPU adds/maxes; single lane-reduce happens in finalize.
            s = sum_acc[...]                                  # (C, 128)
            m = max_acc[...]
            for j in range(n_chunks):                         # static unroll
                lo = j * _LANE
                s = s + x_sum[:, lo:lo + _LANE]
                m = jnp.maximum(m, x_max[:, lo:lo + _LANE])
            sum_acc[...] = s
            max_acc[...] = m
        else:
            # THW not a multiple of 128 (only when THW == HW): reduce directly.
            sum_acc[...] += jnp.sum(x_sum, axis=-1, keepdims=True)      # (C, 1)
            max_acc[...] = jnp.maximum(
                max_acc[...], jnp.max(x_max, axis=-1, keepdims=True))

        @pl.when(k == nk - 1)
        def _finalize():
            s_tot = jnp.sum(sum_acc[...], axis=-1, keepdims=True)       # (C, 1)
            m_tot = jnp.max(max_acc[...], axis=-1, keepdims=True)       # (C, 1)
            avg = s_tot * (1.0 / float(hw_total))                       # true mean
            pooled = jnp.concatenate([avg, m_tot], axis=-1)             # (C, 2)

            w1 = w1_ref[...].astype(jnp.float32)                        # (C_red, C)
            w2 = w2_ref[...].astype(jnp.float32)                        # (C, C_red)
            # Fused MLP: both pooled branches as two columns of one matmul pair.
            h = jnp.maximum(
                jnp.dot(w1, pooled, preferred_element_type=jnp.float32), 0.0)
            out2 = jnp.dot(w2, h, preferred_element_type=jnp.float32)   # (C, 2)
            out = jnp.sum(out2, axis=-1, keepdims=True)                 # avg_out + max_out
            o_ref[0] = jax.nn.sigmoid(out).astype(o_ref.dtype)          # (C, 1)

    return kernel, acc_lanes


def channel_attention(x_nchw, fc1_w, fc2_w, *, max_tile_lanes=2048):
    """x_nchw: (B, C, H, W); fc1_w: (C_red, C, 1, 1); fc2_w: (C, C_red, 1, 1).

    Returns (B, C, 1, 1) attention weights, matching the PyTorch module.
    """
    B, C, H, W = x_nchw.shape
    C_red = fc1_w.shape[0]
    hw = H * W

    x_flat = x_nchw.reshape(B, C, hw)
    w1 = fc1_w.reshape(C_red, C)
    w2 = fc2_w.reshape(C, C_red)

    thw = _choose_tile(hw, C, x_flat.dtype.itemsize, max_lanes_cap=max_tile_lanes)
    n_hw = pl.cdiv(hw, thw)
    kernel, acc_lanes = _make_kernel(C, hw, thw)

    tile_bytes = C * thw * x_flat.dtype.itemsize
    vmem_limit = int(min(64 * 1024 * 1024, max(16 * 1024 * 1024, 4 * tile_bytes)))

    out = pl.pallas_call(
        kernel,
        out_shape=jax.ShapeDtypeStruct((B, C, 1), x_nchw.dtype),
        grid_spec=pltpu.PrefetchScalarGridSpec(
            num_scalar_prefetch=0,
            grid=(B, n_hw),                      # batch parallel, HW reduction last
            in_specs=[
                pl.BlockSpec((1, C, thw), lambda b, k: (b, 0, k)),
                pl.BlockSpec((C_red, C), lambda b, k: (0, 0)),
                pl.BlockSpec((C, C_red), lambda b, k: (0, 0)),
            ],
            out_specs=pl.BlockSpec((1, C, 1), lambda b, k: (b, 0, 0)),
            scratch_shapes=[
                pltpu.VMEM((C, acc_lanes), jnp.float32),   # running sum
                pltpu.VMEM((C, acc_lanes), jnp.float32),   # running max
            ],
        ),
        compiler_params=pltpu.CompilerParams(
            dimension_semantics=("parallel", "arbitrary"),
            vmem_limit_bytes=vmem_limit,
        ),
    )(x_flat, w1, w2)

    return out.reshape(B, C, 1, 1)


def channel_attention_ref(x_nchw, fc1_w, fc2_w):
    """Pure-JAX reference mirroring the PyTorch forward."""
    B, C, H, W = x_nchw.shape
    C_red = fc1_w.shape[0]
    avg = jnp.mean(x_nchw.astype(jnp.float32), axis=(2, 3))   # (B, C)
    mx = jnp.max(x_nchw.astype(jnp.float32), axis=(2, 3))     # (B, C)
    w1 = fc1_w.reshape(C_red, C).astype(jnp.float32)
    w2 = fc2_w.reshape(C, C_red).astype(jnp.float32)

    def mlp(p):
        return jnp.maximum(p @ w1.T, 0.0) @ w2.T

    out = jax.nn.sigmoid(mlp(avg) + mlp(mx)).astype(x_nchw.dtype)
    return out.reshape(B, C, 1, 1)


if __name__ == "__main__":
    key = jax.random.PRNGKey(0)
    kx, k1, k2, kx2 = jax.random.split(key, 4)

    # Shapes consistent with the module: in_channels=32, ratio=16 -> C_red=2.
    B, C, H, W = 2, 32, 16, 16
    ratio = 16
    C_red = C // ratio

    x = jax.random.normal(kx, (B, C, H, W), dtype=jnp.float32)
    fc1_w = jax.random.normal(k1, (C_red, C, 1, 1), dtype=jnp.float32) * 0.1
    fc2_w = jax.random.normal(k2, (C, C_red, 1, 1), dtype=jnp.float32) * 0.1

    # Case 1: HW multiple of 128 -> chunked VPU-accumulation path.
    out = jax.block_until_ready(channel_attention(x, fc1_w, fc2_w))
    ref = jax.block_until_ready(channel_attention_ref(x, fc1_w, fc2_w))
    assert out.shape == (B, C, 1, 1), out.shape
    assert jnp.allclose(out, ref, atol=1e-5, rtol=1e-5), (
        float(jnp.max(jnp.abs(out - ref))))

    # Case 2: HW = 18*18 = 324 with a forced 128-lane tile -> multi-step HW
    # reduction with a masked partial last tile (exercises the streaming path).
    x2 = jax.random.normal(kx2, (B, C, 18, 18), dtype=jnp.float32)
    out2 = jax.block_until_ready(
        channel_attention(x2, fc1_w, fc2_w, max_tile_lanes=128))
    ref2 = jax.block_until_ready(channel_attention_ref(x2, fc1_w, fc2_w))
    assert jnp.allclose(out2, ref2, atol=1e-5, rtol=1e-5), (
        float(jnp.max(jnp.abs(out2 - ref2))))

    print("KERNEL_OK")
</pallas_src>

<mosaic_0001>
module attributes {stable_mosaic.version = 11 : i64} {
  func.func @kernel(%arg0: i32, %arg1: i32, %arg2: memref<1x32x256xf32, #tpu.memory_space<vmem>>, %arg3: memref<2x32xf32, #tpu.memory_space<vmem>>, %arg4: memref<32x2xf32, #tpu.memory_space<vmem>>, %arg5: memref<1x32x1xf32, #tpu.memory_space<vmem>>, %arg6: memref<32x128xf32, #tpu.memory_space<vmem>>, %arg7: memref<32x128xf32, #tpu.memory_space<vmem>>) attributes {dimension_semantics = [#tpu.dimension_semantics<parallel>, #tpu.dimension_semantics<arbitrary>], iteration_bounds = array<i64: 2, 1>, scalar_prefetch = 0 : i64, scratch_operands = 2 : i64, tpu.core_type = #tpu.core_type<tc>, window_params = [{transform_indices = @transform_0, window_bounds = array<i64: 1, 32, 256>}, {pipeline_mode = #tpu.pipeline_mode<synchronous>, transform_indices = @transform_1, window_bounds = array<i64: 2, 32>}, {pipeline_mode = #tpu.pipeline_mode<synchronous>, transform_indices = @transform_2, window_bounds = array<i64: 32, 2>}, {transform_indices = @transform_3, window_bounds = array<i64: 1, 32, 1>}]} {
    %c0_i32 = arith.constant 0 : i32
    %0 = arith.cmpi eq, %arg1, %c0_i32 : i32
    %1 = arith.extui %0 : i1 to i32
    %c0_i32_0 = arith.constant 0 : i32
    %2 = arith.cmpi ne, %1, %c0_i32_0 : i32
    scf.if %2 {
      %cst = arith.constant 0.000000e+00 : f32
      %20 = vector.broadcast %cst : f32 to vector<32x128xf32>
      %c0_13 = arith.constant 0 : index
      %c0_14 = arith.constant 0 : index
      %21 = vector.load %arg6[%c0_13, %c0_14] : memref<32x128xf32, #tpu.memory_space<vmem>>, vector<32x128xf32>
      tpu.vector_store %arg6[%c0_13, %c0_14], %20 {strides = array<i32>} : memref<32x128xf32, #tpu.memory_space<vmem>>, vector<32x128xf32>,
      %cst_15 = arith.constant 0xFF800000 : f32
      %22 = vector.broadcast %cst_15 : f32 to vector<32x128xf32>
      %c0_16 = arith.constant 0 : index
      %c0_17 = arith.constant 0 : index
      %23 = vector.load %arg7[%c0_16, %c0_17] : memref<32x128xf32, #tpu.memory_space<vmem>>, vector<32x128xf32>
      tpu.vector_store %arg7[%c0_16, %c0_17], %22 {strides = array<i32>} : memref<32x128xf32, #tpu.memory_space<vmem>>, vector<32x128xf32>,
    } else {
    }
    %c0 = arith.constant 0 : index
    %c0_1 = arith.constant 0 : index
    %c0_2 = arith.constant 0 : index
    %3 = vector.load %arg2[%c0, %c0_1, %c0_2] : memref<1x32x256xf32, #tpu.memory_space<vmem>>, vector<1x32x256xf32>
    %4 = vector.shape_cast %3 : vector<1x32x256xf32> to vector<32x256xf32>
    %c0_3 = arith.constant 0 : index
    %c0_4 = arith.constant 0 : index
    %5 = vector.load %arg6[%c0_3, %c0_4] : memref<32x128xf32, #tpu.memory_space<vmem>>, vector<32x128xf32>
    %c0_5 = arith.constant 0 : index
    %c0_6 = arith.constant 0 : index
    %6 = vector.load %arg7[%c0_5, %c0_6] : memref<32x128xf32, #tpu.memory_space<vmem>>, vector<32x128xf32>
    %7 = vector.extract_strided_slice %4 {offsets = [0, 0], sizes = [32, 128], strides = [1, 1]} : vector<32x256xf32> to vector<32x128xf32>
    %8 = arith.addf %5, %7 : vector<32x128xf32>
    %9 = vector.extract_strided_slice %4 {offsets = [0, 0], sizes = [32, 128], strides = [1, 1]} : vector<32x256xf32> to vector<32x128xf32>
    %10 = arith.maximumf %6, %9 : vector<32x128xf32>
    %11 = vector.extract_strided_slice %4 {offsets = [0, 128], sizes = [32, 128], strides = [1, 1]} : vector<32x256xf32> to vector<32x128xf32>
    %12 = arith.addf %8, %11 : vector<32x128xf32>
    %13 = vector.extract_strided_slice %4 {offsets = [0, 128], sizes = [32, 128], strides = [1, 1]} : vector<32x256xf32> to vector<32x128xf32>
    %14 = arith.maximumf %10, %13 : vector<32x128xf32>
    %c0_7 = arith.constant 0 : index
    %c0_8 = arith.constant 0 : index
    %15 = vector.load %arg6[%c0_7, %c0_8] : memref<32x128xf32, #tpu.memory_space<vmem>>, vector<32x128xf32>
    tpu.vector_store %arg6[%c0_7, %c0_8], %12 {strides = array<i32>} : memref<32x128xf32, #tpu.memory_space<vmem>>, vector<32x128xf32>,
    %c0_9 = arith.constant 0 : index
    %c0_10 = arith.constant 0 : index
    %16 = vector.load %arg7[%c0_9, %c0_10] : memref<32x128xf32, #tpu.memory_space<vmem>>, vector<32x128xf32>
    tpu.vector_store %arg7[%c0_9, %c0_10], %14 {strides = array<i32>} : memref<32x128xf32, #tpu.memory_space<vmem>>, vector<32x128xf32>,
    %c0_i32_11 = arith.constant 0 : i32
    %17 = arith.cmpi eq, %arg1, %c0_i32_11 : i32
    %18 = arith.extui %17 : i1 to i32
    %c0_i32_12 = arith.constant 0 : i32
    %19 = arith.cmpi ne, %18, %c0_i32_12 : i32
    scf.if %19 {
      %c0_13 = arith.constant 0 : index
      %c0_14 = arith.constant 0 : index
      %20 = vector.load %arg6[%c0_13, %c0_14] : memref<32x128xf32, #tpu.memory_space<vmem>>, vector<32x128xf32>
      %cst = arith.constant dense<0.000000e+00> : vector<32xf32>
      %21 = vector.multi_reduction <add>, %20, %cst [1] : vector<32x128xf32> to vector<32xf32>
      %22 = vector.shape_cast %21 : vector<32xf32> to vector<32x1xf32>
      %c0_15 = arith.constant 0 : index
      %c0_16 = arith.constant 0 : index
      %23 = vector.load %arg7[%c0_15, %c0_16] : memref<32x128xf32, #tpu.memory_space<vmem>>, vector<32x128xf32>
      %cst_17 = arith.constant dense<0xFF800000> : vector<32xf32>
      %24 = vector.multi_reduction <maximumf>, %23, %cst_17 [1] : vector<32x128xf32> to vector<32xf32>
      %25 = vector.shape_cast %24 : vector<32xf32> to vector<32x1xf32>
      %cst_18 = arith.constant 3.906250e-03 : f32
      %26 = vector.broadcast %cst_18 : f32 to vector<32x1xf32>
      %27 = arith.mulf %22, %26 : vector<32x1xf32>
      %28 = tpu.concatenate %27, %25 in 1 : vector<32x1xf32>, vector<32x1xf32> -> vector<32x2xf32>
      %c0_19 = arith.constant 0 : index
      %c0_20 = arith.constant 0 : index
      %29 = vector.load %arg3[%c0_19, %c0_20] : memref<2x32xf32, #tpu.memory_space<vmem>>, vector<2x32xf32>
      %c0_21 = arith.constant 0 : index
      %c0_22 = arith.constant 0 : index
      %30 = vector.load %arg4[%c0_21, %c0_22] : memref<32x2xf32, #tpu.memory_space<vmem>>, vector<32x2xf32>
      %cst_23 = arith.constant dense<0.000000e+00> : vector<2x2xf32>
      %31 = tpu.matmul %29, %28, %cst_23 {dimension_numbers = #tpu.dot_dimension_numbers<[1], [0], [0], [1], [0, 0, 1, 1], [], []>} : vector<2x32xf32>, vector<32x2xf32>, vector<2x2xf32> -> vector<2x2xf32>
      %cst_24 = arith.constant 0.000000e+00 : f32
      %32 = vector.broadcast %cst_24 : f32 to vector<2x2xf32>
      %33 = arith.maximumf %31, %32 : vector<2x2xf32>
      %cst_25 = arith.constant dense<0.000000e+00> : vector<32x2xf32>
      %34 = tpu.matmul %30, %33, %cst_25 {dimension_numbers = #tpu.dot_dimension_numbers<[1], [0], [0], [1], [0, 0, 1, 1], [], []>} : vector<32x2xf32>, vector<2x2xf32>, vector<32x2xf32> -> vector<32x2xf32>
      %cst_26 = arith.constant dense<0.000000e+00> : vector<32xf32>
      %35 = vector.multi_reduction <add>, %34, %cst_26 [1] : vector<32x2xf32> to vector<32xf32>
      %36 = vector.shape_cast %35 : vector<32xf32> to vector<32x1xf32>
      %37 = arith.negf %36 : vector<32x1xf32>
      %38 = math.exp %37 : vector<32x1xf32>
      %cst_27 = arith.constant 1.000000e+00 : f32
      %39 = vector.broadcast %cst_27 : f32 to vector<32x1xf32>
      %40 = arith.addf %39, %38 : vector<32x1xf32>
      %41 = arith.divf %39, %40 : vector<32x1xf32>
      %c0_28 = arith.constant 0 : index
      %c0_29 = arith.constant 0 : index
      %c0_30 = arith.constant 0 : index
      %42 = vector.load %arg5[%c0_28, %c0_29, %c0_30] : memref<1x32x1xf32, #tpu.memory_space<vmem>>, vector<1x32x1xf32>
      %43 = vector.shape_cast %42 : vector<1x32x1xf32> to vector<32x1xf32>
      %44 = vector.shape_cast %41 : vector<32x1xf32> to vector<1x32x1xf32>
      tpu.vector_store %arg5[%c0_28, %c0_29, %c0_30], %44 {strides = array<i32>} : memref<1x32x1xf32, #tpu.memory_space<vmem>>, vector<1x32x1xf32>,
    } else {
    }
    return
  }
  func.func @transform_0(%arg0: i32, %arg1: i32) -> (i32, i32, i32) {
    %c0_i32 = arith.constant 0 : i32
    %c0_i32_0 = arith.constant 0 : i32
    return %arg0, %c0_i32, %arg1 : i32, i32, i32
  }
  func.func @transform_1(%arg0: i32, %arg1: i32) -> (i32, i32) {
    %c0_i32 = arith.constant 0 : i32
    %c0_i32_0 = arith.constant 0 : i32
    %c0_i32_1 = arith.constant 0 : i32
    return %c0_i32, %c0_i32_0 : i32, i32
  }
  func.func @transform_2(%arg0: i32, %arg1: i32) -> (i32, i32) {
    %c0_i32 = arith.constant 0 : i32
    %c0_i32_0 = arith.constant 0 : i32
    %c0_i32_1 = arith.constant 0 : i32
    return %c0_i32, %c0_i32_0 : i32, i32
  }
  func.func @transform_3(%arg0: i32, %arg1: i32) -> (i32, i32, i32) {
    %c0_i32 = arith.constant 0 : i32
    %c0_i32_0 = arith.constant 0 : i32
    %c0_i32_1 = arith.constant 0 : i32
    return %arg0, %c0_i32, %c0_i32_0 : i32, i32, i32
  }
}

</mosaic_0001>

<bundles_post_ra>
// kernel: tpu_custom_call.1
= control target key start
LH: loop header
LB: loop body
LE: loop exit
PB: predicated region body
PF: predicated region fallthrough
CT: control target
= control target key end

     0   :  { %8 = vsyncpa [#allocation5], 0  ;;  %s995_s0 = inlined_call_operand.hbm [shape: f32[2,32,256], index: 0, kind: input, shape index: {}]   ;;  %s996_s1 = inlined_call_operand.vmem [shape: f32[2,32], index: 1, kind: input, shape index: {}]   ;;  %s997_s2 = inlined_call_operand.vmem [shape: f32[32,2], index: 2, kind: input, shape index: {}]   ;;  %s998_s3 = inlined_call_operand.vmem [shape: f32[2,32,1], index: 3, kind: output, shape index: {}]  }
   0x1   :  { %10 = vsyncpa [#allocation5 + $0x1], 0  ;;  %s840_s12 = smov 0   ;;  %s842_s13 = smov 0  }
   0x2   :  { %s844_s14 = smov 0   ;;  %s846_s15 = smov 0  }
   0x3   :  { %s848_s16 = smov 0   ;;  %s850_s17 = smov 0  }
   0x4 LB: > { %s596_s18 = sadd.s32 4294967295, %s812_s17   ;;  %s28_s19 = sadd.s32 1, %s808_s16  ;;  %s812_s17 = sphi %s850_s17, %s16_s17   ;;  %s808_s16 = sphi %s848_s16, %s1006_s16   ;;  %s804_s15 = sphi %s846_s15, %s1005_s15   ;;  %s800_s14 = sphi %s844_s14, %s1004_s14   ;;  %s796_s13 = sphi %s842_s13, %s1003_s13   ;;  %s792_s12 = sphi %s840_s12, %s1002_s12  }
   0x5   : > { %p30_p0 = scmp.ge.s32.totalorder %s28_s19, 2  ;;  %s37_s20 = sadd.s32 1, %s800_s14 }
   0x6   : > { %p44_p1 = scmp.ne.s32.totalorder %s800_s14, %s796_s13  ;;  %p45_p2 = scmp.eq.s32.totalorder %s812_s17, 0 }
   0x7   : > { %s1008_s19 = smov (%p30_p0, %s28_s19), 0  ;;  %p50_p4 = scmp.ne.s32.totalorder %s796_s13, %s792_s12 }
   0x8   : > { %p876_p3 = por %p45_p2, %p44_p1  ;;  %s32_s22 = ssub.s32 %s808_s16, %s1008_s19 }
   0x9   : > { %p51_p5 = scmp.eq.s32.totalorder %s596_s18, 0  ;;  %p35_p6 = scmp.eq.s32.totalorder %s32_s22, 0 }
   0xa   : > { %p662_p8 = scmp.lt.s32.totalorder %s812_s17, 2  ;;  %s148_s25 = sand.u32 1, %s800_s14  }
   0xb   : > { %p883_p7 = por %p51_p5, %p50_p4  ;;  %s619_s26 = sshll.u32 %s808_s16, 10 }
   0xc   : > { %s889_s24 = scalar_select %p35_p6, %s800_s14, %s37_s20  }
   0xd   : > { %s600_s27 = sshll.u32 %s148_s25, 6  ;;  %s896_s30 = scalar_lea.hbm %s995_s0, %s619_s26 }
   0xe   : > { %s152_s4 = scalar_lea.vmem [#allocation4], %s600_s27  ;;  %p900_p9 = pnand %p662_p8, %p876_p3 }
   0xf   : > { %s161_s5 = sshll.u32 %s152_s4, 4  ;;  %s906_s7 = scalar_lea.sflag [#allocation5], %s148_s25  ;;  %s904_s5 = int_to_ptr.vmem [resolvable:$true] %s161_s5 }
  0x10   : > { %s732_s8 = scalar_lea.hbm %s896_s30, 1024  ;;  %p734_p11 = pneg %p900_p9 }
  0x11   : > { %p733_p10 = scmp.ne.s32.totalorder %s896_s30, %s732_s8  ;;  %s737_s11 = scalar_lea.hbm %s995_s0, 2048 }
  0x12   : > { %p738_p0 = scmp.lt.u32.totalorder %s896_s30, %s995_s0  ;;  %p739_p1 = scmp.lt.u32.totalorder %s737_s11, %s732_s8 }
  0x13   : > { %p735_p12 = pnand %p734_p11, %p733_p10  ;;  %p741_p3 = scmp.lt.u32.totalorder %s732_s8, %s896_s30 }
  0x14   : > { %p740_p2 = por %p739_p1, %p738_p0 }
  0x15   : > { %p736_p13 = pneg %p735_p12 }
  0x16   : > { %p742_p4 = por %p741_p3, %p740_p2 }
  0x18   : > { %p743_p5 = pnand %p742_p4, %p736_p13 }
  0x1a   : > { %746 = shalt.err (!%p743_p5)
}
  0x1b   : > { %s747_s20 = scalar_lea.vmem %s904_s5, 1024  ;;  %s814_s21 = smov [#allocation4]  }
  0x1c   : > { %p748_p6 = scmp.ne.s32.totalorder %s904_s5, %s747_s20  ;;  %s752_s22 = sshll.u32 %s814_s21, 4  ;;  %s753_s22 = int_to_ptr.vmem [resolvable:$false] %s752_s22 }
  0x1d   : > { %s754_s25 = scalar_lea.vmem %s753_s22, 2048  ;;  %p755_p12 = scmp.lt.s32.totalorder %s904_s5, %s753_s22 }
  0x1e   : > { %p750_p8 = pnand %p748_p6, %p734_p11  ;;  %p756_p0 = scmp.lt.s32.totalorder %s754_s25, %s747_s20 }
  0x20   : > { %p751_p10 = pneg %p750_p8  ;;  %p757_p1 = por %p756_p0, %p755_p12 }
  0x22   : > { %p758_p2 = pnand %p757_p1, %p751_p10 }
  0x24   : > { %761 = shalt.err (!%p758_p2)
}
  0x25   : > { %s815_s26 = smov 256   ;;  %s816_s27 = smov 16  }
  0x26   : > { %661 = dma.hbm_to_vmem [thread:$0]  (!%p900_p9), %s896_s30, 1024, %s904_s5, %s906_s7, %s815_s26, %s815_s26, %s816_s27  }
  0x27   : > { %p603_p11 = scmp.ge.s32.totalorder %s812_s17, 1  ;;  %p169_p13 = scmp.lt.s32.totalorder %s812_s17, 3 }
  0x29   : > { %p170_p3 = pnand %p603_p11, %p169_p13 }
  0x2a   : > { %s175_s28 = sand.u32 (!%p170_p3), 1, %s796_s13  }
  0x2b   : > { %173 = sbr.rel (%p170_p3) target bundleno = 817 (0x331), region = 32  ;;  %s604_s29 = sshll.u32 (!%p170_p3), %s175_s28, 6 }
  0x2c   : > { %s176_s4 = scalar_lea.sflag (!%p170_p3), [#allocation5], %s175_s28  ;;  %s179_s8 = scalar_lea.vmem (!%p170_p3), [#allocation4], %s604_s29 }
  0x32   : > { %787 = dma.done.wait (%p883_p7), %s176_s4, 1024  }
  0x33   : > { %789 = vsyncadd (%p883_p7), %s176_s4, 4294966272  ;;  %v220_v0 = vld [vmem:[%s179_s8] sm:$0xff]  ;;  %v221_v1 = vld [vmem:[%s179_s8 + $0x8] sm:$0xff]  ;;  %v817_v16 = vmov 0.0|0.0   ;;  %vm818_vm0 = vmmov 0   ;;  %v819_v17 = vmov 0.0  }
  0x34   : > { %v222_v2 = vld [vmem:[%s179_s8 + $0x10] sm:$0xff]  ;;  %v248_v3 = vmax.f32 %v220_v0, %v221_v1  ;;  %v244_v4 = vadd.f32 %v221_v1, %v220_v0  ;;  %v223_v5 = vld [vmem:[%s179_s8 + $0x18] sm:$0xff]  ;;  %v224_v10 = vld [vmem:[%s179_s8 + $0x20] sm:$0xff]  ;;  %650 = vmatprep.subr.bf16.mxu0 %v817_v16  ;;  %639 = vmatprep.mubr.msk.f32.mxu0 %vm818_vm0, %v819_v17  ;;  %vm291_vm1 = vcmask 7168   ;;  %vm301_vm2 = vcmask 261120   ;;  %p203_p7 = scmp.lt.s32.totalorder %s804_s15, 1 }
  0x35   : > { %v249_v6 = vmax.f32 %v222_v2, %v223_v5  ;;  %v245_v7 = vadd.f32 %v223_v5, %v222_v2  ;;  %v226_v8 = vld [vmem:[%s179_s8 + $0x30] sm:$0xff]  ;;  %v227_v9 = vld [vmem:[%s179_s8 + $0x38] sm:$0xff]  ;;  %v225_v11 = vld [vmem:[%s179_s8 + $0x28] sm:$0xff]  ;;  %vm376_vm3 = vcmask 15360   ;;  %vm389_vm4 = vcmask 1041408  }
  0x36   : > { %279 = vmax.xlane.f32.xlu1 %v248_v3  ;;  %267 = vadd.xlane.f32.xlu0 %v244_v4  ;;  %v247_v12 = vadd.f32 %v227_v9, %v226_v8  ;;  %v246_v13 = vadd.f32 %v225_v11, %v224_v10  ;;  %v251_v14 = vmax.f32 %v226_v8, %v227_v9  ;;  %v296_v36 = vld [vmem:[%s996_s1] sm:$0x3]  ;;  %v298_v41 = vld [vmem:[%s997_s2 + $0x8] sm:$0xff]  ;;  %v299_v42 = vld [vmem:[%s997_s2 + $0x10] sm:$0xff]  ;;  %s1010_s15 = smov (!%p203_p7, %s804_s15), 1 }
  0x37   : > { %v250_v15 = vmax.f32 %v224_v10, %v225_v11  ;;  %v297_v37 = vld [vmem:[%s997_s2] sm:$0xff]  ;;  %v300_v43 = vld [vmem:[%s997_s2 + $0x18] sm:$0xff]  ;;  %s620_s20 = sshll.u32 %s1010_s15, 5 }
  0x38   : > { %644 = vmatprep.mubr.msk.f32.mxu1 %vm376_vm3, %v297_v37  ;;  %s207_s25 = scalar_lea.vmem %s998_s3, %s620_s20 }
  0x3a   : > { %281 = vmax.xlane.f32.xlu1 %v249_v6  ;;  %269 = vadd.xlane.f32.xlu0 %v245_v7 }
  0x3e   : > { %273 = vadd.xlane.f32.xlu1 %v247_v12  ;;  %271 = vadd.xlane.f32.xlu0 %v246_v13 }
  0x42   : > { %285 = vmax.xlane.f32.xlu1 %v251_v14  ;;  %283 = vmax.xlane.f32.xlu0 %v250_v15 }
  0xc3   : > { %v280_v18 = vpop.xlane.xlu1 %279  ;;  %v268_v19 = vpop.xlane.xlu0 %267 }
  0xc4   : > { %v287_v20 = vmul.f32 0.00390625, %v268_v19 }
  0xc6   : > { %v292_v24 = vsel %vm291_vm1, %v287_v20, %v280_v18 }
  0xc7   : > { %v282_v21 = vpop.xlane.xlu1 %281  ;;  %v270_v22 = vpop.xlane.xlu0 %269 }
  0xc8   : > { %v288_v23 = vmul.f32 0.00390625, %v270_v22 }
  0xca   : > { %v293_v25 = vsel %vm291_vm1, %v288_v23, %v282_v21 }
  0xcb   : > { %v274_v26 = vpop.xlane.xlu1 %273  ;;  %v272_v27 = vpop.xlane.xlu0 %271  ;;  %v651_v28 = vpack.c.bf16 %v293_v25, %v292_v24 }
  0xcc   : > { %v290_v29 = vmul.f32 0.00390625, %v274_v26  ;;  %v289_v30 = vmul.f32 0.00390625, %v272_v27 }
  0xcd   : > { %652 = vmatpush3.bf16.msra.mxu0 %v651_v28 }
  0xce   : > { %653 = vmatprep.subr.bf16.mxu0 %v817_v16 }
  0xcf   : > { %v286_v31 = vpop.xlane.xlu1 %285  ;;  %v284_v32 = vpop.xlane.xlu0 %283 }
  0xd0   : > { %v295_v33 = vsel %vm291_vm1, %v290_v29, %v286_v31  ;;  %v294_v34 = vsel %vm291_vm1, %v289_v30, %v284_v32 }
  0xd1   : > { %v654_v35 = vpack.c.bf16 %v295_v33, %v294_v34 }
  0xd3   : > { %655 = vmatpush3.bf16.msra.mxu0 %v654_v35 }
  0xd6   : > { %640 = vmatmul.mubr.msk.f32.vlgmr.msra.gmra.mrb[0].mxu0 %vm301_vm2, %v296_v36 }
 0x1a9   : > { %v371_v38 = vpop.f32.mrb[0].mxu0 }
 0x1aa   : > { %v375_v39 = vmax.f32 %v371_v38, 0.0  ;;  %v641_v40 = vpop.f32.mrb[1].mxu0 }
 0x1ac   : > { %642 = vmatprep.subr.msk.mxu1 %vm389_vm4, %v375_v39 }
 0x1ad   : > { %643 = vmatpush3.msk.msra.mxu1 %vm389_vm4, %v375_v39 }
 0x1ae   : > { %645 = vmatmul.mubr.msk.f32.vlgmr.msra.gmra.mrb[0].mxu1 %vm376_vm3, %v298_v41 }
 0x1af   : > { %647 = vmatprep.mubr.msk.f32.mxu1 %vm376_vm3, %v299_v42 }
 0x1b2   : > { %648 = vmatmul.mubr.msk.f32.gmra.mrb[2].mxu1 %vm376_vm3, %v300_v43 }
 0x281   : > { %v646_v44 = vpop.f32.mrb[0].mxu1 }
 0x282   : > { %v459_v45 = vpop.f32.mrb[1].mxu1  ;;  %v481_v46 = vsel %vm376_vm3, %v646_v44, 0.0 }
 0x283   : > { %482 = vadd.xlane.f32.xlu1 %v481_v46  ;;  %v478_v47 = vsel %vm376_vm3, %v459_v45, 0.0 }
 0x284   : > { %479 = vadd.xlane.f32.xlu0 %v478_v47 }
 0x285   : > { %v649_v48 = vpop.f32.mrb[2].mxu1 }
 0x286   : > { %v469_v49 = vpop.f32.mrb[3].mxu1  ;;  %v487_v50 = vsel %vm376_vm3, %v649_v48, 0.0 }
 0x287   : > { %488 = vadd.xlane.f32.xlu1 %v487_v50  ;;  %v484_v51 = vsel %vm376_vm3, %v469_v49, 0.0 }
 0x288   : > { %485 = vadd.xlane.f32.xlu0 %v484_v51 }
 0x310   : > { %v483_v52 = vpop.xlane.xlu1 %482 }
 0x311   : > { %v614_v53 = vmul.f32 -1.442695, %v483_v52  ;;  %v480_v54 = vpop.xlane.xlu0 %479 }
 0x312   : > { %v613_v55 = vmul.f32 -1.442695, %v480_v54 }
 0x313   : > { %716 = vpow2.f32 %v614_v53 }
 0x314   : > { %718 = vpow2.f32 %v613_v55  ;;  %v489_v56 = vpop.xlane.xlu1 %488 }
 0x315   : > { %v616_v57 = vmul.f32 -1.442695, %v489_v56  ;;  %v486_v58 = vpop.xlane.xlu0 %485 }
 0x316   : > { %v615_v59 = vmul.f32 -1.442695, %v486_v58 }
 0x317   : > { %720 = vpow2.f32 %v616_v57 }
 0x318   : > { %722 = vpow2.f32 %v615_v59 }
 0x31d   : > { %v717_v60 = vpop.eup %716 }
 0x31e   : > { %v719_v61 = vpop.eup %718  ;;  %v503_v62 = vadd.f32 1.0, %v717_v60 }
 0x31f   : > { %v502_v63 = vadd.f32 1.0, %v719_v61 }
 0x320   : > { %724 = vrcp.f32 %v503_v62 }
 0x321   : > { %v721_v0 = vpop.eup %720  ;;  %726 = vrcp.f32 %v502_v63 }
 0x322   : > { %v723_v1 = vpop.eup %722  ;;  %v505_v2 = vadd.f32 1.0, %v721_v0 }
 0x323   : > { %v504_v3 = vadd.f32 1.0, %v723_v1 }
 0x324   : > { %728 = vrcp.f32 %v505_v2 }
 0x325   : > { %730 = vrcp.f32 %v504_v3 }
 0x32a   : > { %v725_v4 = vpop.eup %724 }
 0x32b   : > { %v727_v5 = vpop.eup %726  ;;  %515 = vst.msk [vmem:[%s207_s25 + $0x8] sm:$0xff] %vm291_vm1, %v725_v4 }
 0x32c   : > { %514 = vst.msk [vmem:[%s207_s25] sm:$0xff] %vm291_vm1, %v727_v5 }
 0x32e   : > { %v729_v6 = vpop.eup %728 }
 0x32f   : > { %v731_v7 = vpop.eup %730  ;;  %517 = vst.msk [vmem:[%s207_s25 + $0x18] sm:$0xff] %vm291_vm1, %v729_v6 }
 0x330   : > { %516 = vst.msk [vmem:[%s207_s25 + $0x10] sm:$0xff] %vm291_vm1, %v731_v7 }
 0x331 PF: > { %s16_s17 = sadd.s32 1, %s812_s17   ;;  %s1002_s12 = smov %s796_s13 }
 0x332   : > { %p13_p9 = scmp.ge.s32.totalorder %s16_s17, 4   ;;  %s1003_s13 = smov %s800_s14 }
 0x333   : > { %s1004_s14 = smov %s889_s24  ;;  %s1005_s15 = smov %s808_s16 }
 0x334   : > { %s1006_s16 = smov %s1008_s19  ;;  %15 = sbr.rel (!%p13_p9) target bundleno = 4 (0x4), region = 80 }
 0x33b   :  { %539 = vsyncpa [#allocation5], 1 }
 0x33c   :  { %541 = vsyncpa [#allocation5 + $0x1], 1 }

</bundles_post_ra>
